<compile_context>
chip_gen: v5e
topology: v5e:2x2
jax: 0.10.0
libtpu: 0.0.40
codegen_flags: <defaults>
</compile_context>

<pallas_src>
import functools

import jax
import jax.numpy as jnp
import numpy as np
from jax.experimental import pallas as pl
from jax.experimental.pallas import tpu as pltpu

# Small synthetic shapes consistent with the module (in=2048, out=256 scaled down)
N, CIN, COUT = 2, 16, 8
H = W = 16
HW = H * W
NHW = N * HW
DILATIONS = (6, 12, 18)            # cfg.MODEL.OUTPUT_STRIDE == 16


@functools.lru_cache(maxsize=None)
def _roll_sign():
    """Calibrate pltpu.roll's rotation direction once (np.roll convention)."""
    def k(x_ref, o_ref):
        o_ref[...] = pltpu.roll(x_ref[...], shift=1, axis=1)

    x = jax.lax.broadcasted_iota(jnp.int32, (8, 128), 1)
    r = pl.pallas_call(k, out_shape=jax.ShapeDtypeStruct((8, 128), jnp.int32))(x)
    # np.roll convention: result[i] = x[i - shift]  ->  r[0, 1] == 0.  We want
    # result[i] = x[i + off], i.e. shift = -off (sign = -1).
    return -1 if int(r[0, 1]) == 0 else +1


def _aspp_kernel(x_ref, dwp_ref, w0p_ref, wb_ref, wfb_ref, wfp_ref, bias_ref,
                 o_ref, *, roll_sign: int = -1):
    # Merge the batch onto the lane axis: (CIN, N*HW).  HW == 256, so the concat
    # and every lane slice below sit on 128-lane tile boundaries (no relayout).
    x2d = jnp.concatenate([x_ref[n] for n in range(N)], axis=1)      # (CIN, NHW) f32
    x_bf = x2d.astype(jnp.bfloat16)
    bias = bias_ref[...]                                             # (COUT, 6) f32

    # Flat lane position -> per-image row / column indices (batch aware).
    pos = jax.lax.broadcasted_iota(jnp.int32, (1, NHW), 1)
    col = pos % W
    row = (pos % HW) // W

    # Hoisted validity masks: one per distinct dy (row) / dx (col) offset,
    # shared by every tap that uses that offset.
    row_ok, col_ok = {}, {}
    for d in DILATIONS:
        for s in (-d, d):
            if abs(s) < H and s not in row_ok:
                row_ok[s] = jnp.logical_and(row + s >= 0, row + s < H)
            if abs(s) < W and s not in col_ok:
                col_ok[s] = jnp.logical_and(col + s >= 0, col + s < W)

    def tap(dy, dx):
        """x[:, r+dy, c+dx] on the flat lane axis, zero outside each image."""
        off = dy * W + dx
        t = pltpu.roll(x2d, shift=(roll_sign * off) % NHW, axis=1)   # XLU rotate
        m = row_ok[dy] if dy != 0 else None
        if dx != 0:
            m = col_ok[dx] if m is None else jnp.logical_and(m, col_ok[dx])
        return jnp.where(m, t, 0.0)

    # ---- aspp0 and the pool-branch 1x1 conv share one matmul against x -------
    y01 = jnp.dot(w0p_ref[...], x_bf, preferred_element_type=jnp.float32)
    x0 = jnp.maximum(y01[:COUT] + bias[:, 0:1], 0.0)                 # (COUT, NHW)

    # image pooling: GAP(conv(x)) == conv(GAP(x)); GAP per 256-lane image
    # segment (tile-aligned slices).  The pool branch enters the final 1x1 as a
    # rank-1 per-image column (no HW broadcast, no 5*COUT concat); the final BN
    # shift is folded into the same column.
    pool_sp = y01[COUT:]                                             # (COUT, NHW)
    pool_cols = []
    for n in range(N):
        pm = jnp.mean(pool_sp[:, n * HW:(n + 1) * HW], axis=1, keepdims=True)
        py = jnp.maximum(pm + bias[:, 4:5], 0.0)                     # (COUT, 1)
        pool_cols.append(
            jnp.dot(wfp_ref[...], py, preferred_element_type=jnp.float32)
            + bias[:, 5:6])                                          # (COUT, 1)

    # ---- final 1x1 conv accumulated branch by branch (de-zeroed matmuls) -----
    out = jnp.dot(wfb_ref[0], x0.astype(jnp.bfloat16),
                  preferred_element_type=jnp.float32)                # (COUT, NHW)

    # ---- separable branches: depthwise (roll + mask taps) -> BN/ReLU -> 1x1 --
    for bi, dil in enumerate(DILATIONS):
        wtaps = dwp_ref[bi]                      # (CIN, 10): 9 BN-scaled taps + bias
        acc = x2d * wtaps[:, 4:5]                # center tap
        for k in range(9):
            if k == 4:
                continue
            ky, kx = divmod(k, 3)
            dy, dx = (ky - 1) * dil, (kx - 1) * dil
            if abs(dy) >= H or abs(dx) >= W:     # tap reads only zero padding
                continue
            acc = acc + tap(dy, dx) * wtaps[:, k:k + 1]
        acc = jnp.maximum(acc + wtaps[:, 9:10], 0.0)        # depthwise BN + ReLU
        xb = jnp.dot(wb_ref[bi], acc.astype(jnp.bfloat16),
                     preferred_element_type=jnp.float32)
        xb = jnp.maximum(xb + bias[:, bi + 1:bi + 2], 0.0)  # pointwise BN + ReLU
        out = out + jnp.dot(wfb_ref[bi + 1], xb.astype(jnp.bfloat16),
                            preferred_element_type=jnp.float32)

    # Broadcast each image's (pool + final-bias) column across its lane segment.
    pb = pool_cols[0]
    for n in range(1, N):
        pb = jnp.where(pos >= n * HW, pool_cols[n], pb)
    out = jnp.maximum(out + pb, 0.0)
    # Dropout2d(p=0.1): identity in eval mode.
    for n in range(N):                           # tile-aligned, unmasked lane-dense stores
        o_ref[n] = out[:, n * HW:(n + 1) * HW]


def aspp_forward(x_nchw, p):
    # Free reshape only: NCHW -> (N, C, H*W).  No transpose, no HBM pad copy.
    x = x_nchw.reshape(N, CIN, HW).astype(jnp.float32)

    # ---- fold BN scales into weights; pack biases (tiny one-off XLA ops) -----
    w_pw = jnp.transpose(p["w1x1"], (0, 2, 1)) * p["s1"][:, :, None]      # (5, COUT, CIN)
    w0p = jnp.concatenate([w_pw[0], w_pw[4]], axis=0).astype(jnp.bfloat16)  # [aspp0|pool]
    wb = w_pw[1:4].astype(jnp.bfloat16)                                   # (3, COUT, CIN)

    # depthwise taps: (3,3,3,CIN) -> (3, CIN, 9) with BN scale folded in; the
    # depthwise-BN bias is appended as a 10th "tap" so no (CIN,1) operand pads
    # 128x in VMEM.
    dw = jnp.transpose(p["dw"].reshape(3, 9, CIN), (0, 2, 1)) * p["dws"][:, :, None]
    dwp = jnp.concatenate([dw, p["dwb"][:, :, None]], axis=2)             # (3, CIN, 10)

    # final 1x1 conv: fold BN scale into rows, split into per-branch blocks
    # ordered [pool | x0 | x1 | x2 | x3] (torch.cat order).
    wf_t = p["wf"].T * p["sf"].reshape(COUT, 1)                           # (COUT, 5*COUT)
    wf_blocks = jnp.transpose(wf_t.reshape(COUT, 5, COUT), (1, 0, 2))     # (5, COUT, COUT)
    wfp = wf_blocks[0]                                                    # pool block, f32
    wfb = wf_blocks[1:].astype(jnp.bfloat16)                              # (4, COUT, COUT)

    # packed per-channel biases: [b_aspp0, b_pw1, b_pw2, b_pw3, b_pool, b_final]
    bias = jnp.stack([p["b1"][0], p["b1"][1], p["b1"][2], p["b1"][3],
                      p["b1"][4], p["bf"].reshape(COUT)], axis=1)         # (COUT, 6)

    kernel = functools.partial(_aspp_kernel, roll_sign=_roll_sign())
    out = pl.pallas_call(
        kernel,
        out_shape=jax.ShapeDtypeStruct((N, COUT, HW), jnp.float32),
    )(x, dwp, w0p, wb, wfb, wfp, bias)
    return out.reshape(N, COUT, H, W)            # free reshape, still NCHW


def make_params(key):
    kw, kdw, kwf, kbn = jax.random.split(key, 4)
    w1x1 = 0.1 * jax.random.normal(kw, (5, CIN, COUT), jnp.float32)
    dw = 0.1 * jax.random.normal(kdw, (3, 3, 3, CIN), jnp.float32)
    wf = 0.1 * jax.random.normal(kwf, (5 * COUT, COUT), jnp.float32)

    def bn_fold(k, shape):
        kg, kb, km, kv = jax.random.split(k, 4)
        gamma = 1.0 + 0.1 * jax.random.normal(kg, shape, jnp.float32)
        beta = 0.1 * jax.random.normal(kb, shape, jnp.float32)
        mean = 0.1 * jax.random.normal(km, shape, jnp.float32)
        var = 0.5 + jax.random.uniform(kv, shape, jnp.float32)
        scale = gamma * jax.lax.rsqrt(var + 1e-5)
        shift = beta - mean * scale
        return scale, shift

    k1, k2, k3 = jax.random.split(kbn, 3)
    s1, b1 = bn_fold(k1, (5, COUT))
    dws, dwb = bn_fold(k2, (3, CIN))
    sf, bf = bn_fold(k3, (1, COUT))
    return dict(w1x1=w1x1, s1=s1, b1=b1, dw=dw, dws=dws, dwb=dwb,
                wf=wf, sf=sf, bf=bf)


def ref_forward(x, p):
    """Pure-JAX NCHW reference matching the PyTorch forward (eval mode)."""
    def c1x1(v, w):
        return jnp.einsum("nchw,cd->ndhw", v, w)

    def bnrelu(v, s, b):
        return jnp.maximum(v * s[None, :, None, None] + b[None, :, None, None], 0.0)

    pool = jnp.mean(x, axis=(2, 3), keepdims=True)
    pool = bnrelu(c1x1(pool, p["w1x1"][4]), p["s1"][4], p["b1"][4])
    pool = jnp.broadcast_to(pool, (N, COUT, H, W))               # bilinear of 1x1

    x0 = bnrelu(c1x1(x, p["w1x1"][0]), p["s1"][0], p["b1"][0])

    outs = [pool, x0]
    for bi, d in enumerate(DILATIONS):
        xp = jnp.pad(x, ((0, 0), (0, 0), (d, d), (d, d)))
        acc = jnp.zeros_like(x)
        for ky in range(3):
            for kx in range(3):
                acc = acc + (xp[:, :, ky * d:ky * d + H, kx * d:kx * d + W]
                             * p["dw"][bi, ky, kx][None, :, None, None])
        acc = bnrelu(acc, p["dws"][bi], p["dwb"][bi])
        outs.append(bnrelu(c1x1(acc, p["w1x1"][bi + 1]),
                           p["s1"][bi + 1], p["b1"][bi + 1]))

    cat = jnp.concatenate(outs, axis=1)
    return bnrelu(c1x1(cat, p["wf"]), p["sf"][0], p["bf"][0])


if __name__ == "__main__":
    key = jax.random.PRNGKey(0)
    kx, kp = jax.random.split(key)
    x = jax.random.normal(kx, (N, CIN, H, W), jnp.float32)
    params = make_params(kp)

    out = jax.block_until_ready(aspp_forward(x, params))
    assert out.shape == (N, COUT, H, W)

    ref = ref_forward(x, params)
    # Tolerance sized for bf16 MXU operands (f32 accumulation, f32 epilogues).
    np.testing.assert_allclose(np.asarray(out), np.asarray(ref),
                               rtol=2e-2, atol=2e-2)
    print("KERNEL_OK")
</pallas_src>

<mosaic_0001>
module attributes {stable_mosaic.version = 11 : i64} {
  func.func @k(%arg0: memref<8x128xi32, #tpu.memory_space<vmem>>, %arg1: memref<8x128xi32, #tpu.memory_space<vmem>>) attributes {dimension_semantics = [], scalar_prefetch = 0 : i64, scratch_operands = 0 : i64, tpu.core_type = #tpu.core_type<tc>} {
    %c0 = arith.constant 0 : index
    %c0_0 = arith.constant 0 : index
    %0 = vector.load %arg0[%c0, %c0_0] : memref<8x128xi32, #tpu.memory_space<vmem>>, vector<8x128xi32>
    %c1_i32 = arith.constant 1 : i32
    %1 = tpu.dynamic_rotate %0 by %c1_i32 dim 1 : vector<8x128xi32>, i32 -> vector<8x128xi32>
    %c0_1 = arith.constant 0 : index
    %c0_2 = arith.constant 0 : index
    %2 = vector.load %arg1[%c0_1, %c0_2] : memref<8x128xi32, #tpu.memory_space<vmem>>, vector<8x128xi32>
    tpu.vector_store %arg1[%c0_1, %c0_2], %1 {strides = array<i32>} : memref<8x128xi32, #tpu.memory_space<vmem>>, vector<8x128xi32>,
    return
  }
}

</mosaic_0001>

<bundles_post_ra>
// kernel: tpu_custom_call.1
= control target key start
LH: loop header
LB: loop body
LE: loop exit
PB: predicated region body
PF: predicated region fallthrough
CT: control target
= control target key end

     0   :  { %6 = vsyncpa [#allocation3], 0  ;;  %s118_s0 = inlined_call_operand.hbm [shape: s32[8,128], index: 0, kind: input, shape index: {}]   ;;  %s119_s1 = inlined_call_operand.hbm [shape: s32[8,128], index: 1, kind: output, shape index: {}]  }
   0x1   :  { %7 = vsyncpa [#allocation4], 0  ;;  %s13_s8 = sshll.u32 %s118_s0, 4  ;;  %s99_s9 = smov [#allocation2]   ;;  %s14_s8 = int_to_ptr.hbm [resolvable:$true] %s13_s8 }
   0x2   :  { %s15_s10 = sshll.u32 %s99_s9, 4  ;;  %s16_s10 = int_to_ptr.vmem [resolvable:$true] %s15_s10 }
   0x3   :  { %18 = dma.hbm_to_vmem [thread:$0]  %s14_s8, 128, %s16_s10, [#allocation3]  }
   0x4   :  { %95 = dma.done.wait [#allocation3], 128  }
   0x5   :  { %96 = vsyncadd [#allocation3], 4294967168  ;;  %v23_v0 = vld [vmem:[#allocation2] sm:$0xff]  ;;  %s100_s11 = smov 1   ;;  %s101_s12 = smov [#allocation5]  }
   0x6   :  { %24 = vrot.lane.b32.xlu0 %v23_v0, %s100_s11  ;;  %s32_s13 = sshll.u32 %s101_s12, 4  ;;  %s34_s16 = sshll.u32 %s119_s1, 4  ;;  %s33_s13 = int_to_ptr.vmem [resolvable:$true] %s32_s13  ;;  %s35_s16 = int_to_ptr.hbm [resolvable:$true] %s34_s16 }
  0x78   :  { %v25_v1 = vpop.permute.xlu0 %24 }
  0x79   :  { %26 = vst [vmem:[#allocation5] sm:$0xff] %v25_v1 }
  0x7a   :  { %37 = dma.vmem_to_hbm [thread:$0]  %s33_s13, 128, %s35_s16, [#allocation4]  }
  0x7b   :  { %97 = dma.done.wait [#allocation4], 128  }
  0x7c   :  { %98 = vsyncadd [#allocation4], 4294967168 }
  0x7d   :  { %42 = vsyncpa [#allocation3], 1 }
  0x7e   :  { %43 = vsyncpa [#allocation4], 1 }

</bundles_post_ra>
